<compile_context>
chip_gen: v7x
topology: tpu7x:2x2x1
jax: 0.10.0
libtpu: 0.0.40
codegen_flags: <defaults>
</compile_context>

<pallas_src>
from functools import partial

import jax
import jax.numpy as jnp
from jax.experimental import pallas as pl
from jax.experimental.pallas import tpu as pltpu

H = 32       # hidden_size
V = 16       # output_size (vocab size)
L = 8        # max_length
LANES = 128

# ---- packed layouts -------------------------------------------------------
# f32 slab (TAB_ROWS, 128): per-token tables + bias rows (dynamically indexed
# / tiny, so kept f32).
A0 = 96                       # lane offset of the attention columns
RB_H = V                      # bias row: b_hn at lanes 2H:3H (h-path GRU)
RB_X = V + 1                  # bias row: (b_ir+b_hr | b_iz+b_hz | b_in)
RB_O = V + 2                  # bias row: out bias at lanes 0:V
TAB_ROWS = V + 8              # 24 rows

# bf16 slab (W_ROWS, 128): the static weight blocks.
R_WH, R_WX, R_WO = 0, 32, 64  # each H=32 rows (multiples of 16 -> clean bf16 tiles)
W_ROWS = 96

# Output row lane layout: [logp(V) | h(H) | attn(L) | token_id | pad]
O_ID = V + H + L              # = 56


def _gru_attn_step(tab, h, wh, wx, wo, b_h, b_x, b_o, enc):
    """One decoder step. tab: (1,128) per-token table row, h: (1,H) f32."""
    # h-path: [h_r | h_z | h_n(+b_hn) | attn-logit part] in one (1,H)@(H,128) dot.
    gh = jnp.dot(h, wh, preferred_element_type=jnp.float32) + b_h
    # attention logits = table part (emb@Wattn_top + b_attn) + hidden part.
    logits = tab[:, A0:A0 + L] + gh[:, A0:A0 + L]
    logits = logits - jnp.max(logits, axis=1, keepdims=True)
    e = jnp.exp(logits)
    attn_w = e / jnp.sum(e, axis=1, keepdims=True)               # exact softmax
    # attn_applied @ Wcomb_bot collapsed into attn_w @ (enc @ Wcomb_bot).
    cx = jnp.dot(attn_w, enc, preferred_element_type=jnp.float32)  # (1,128)
    x = jnp.maximum(tab[:, 0:H] + cx[:, 0:H], 0.0)               # relu(combine)
    # x-path GRU gates in one (1,H)@(H,128) dot.
    gx = jnp.dot(x, wx, preferred_element_type=jnp.float32) + b_x
    r = jax.nn.sigmoid(gx[:, 0:H] + gh[:, 0:H])
    z = jax.nn.sigmoid(gx[:, H:2 * H] + gh[:, H:2 * H])
    n = jnp.tanh(gx[:, 2 * H:3 * H] + r * gh[:, 2 * H:3 * H])
    h_new = (1.0 - z) * n + z * h
    # output projection + log_softmax.
    o = (jnp.dot(h_new, wo, preferred_element_type=jnp.float32) + b_o)[:, 0:V]
    s = o - jnp.max(o, axis=1, keepdims=True)
    logp = s - jnp.log(jnp.sum(jnp.exp(s), axis=1, keepdims=True))
    return logp, h_new, attn_w


def _load_weights(tab_ref, w_ref):
    wh = w_ref[R_WH:R_WH + H, :].astype(jnp.float32)
    wx = w_ref[R_WX:R_WX + H, :].astype(jnp.float32)
    wo = w_ref[R_WO:R_WO + H, :].astype(jnp.float32)
    b_h = tab_ref[RB_H:RB_H + 1, :]
    b_x = tab_ref[RB_X:RB_X + 1, :]
    b_o = tab_ref[RB_O:RB_O + 1, :]
    return wh, wx, wo, b_h, b_x, b_o


def decoder_step_kernel(idx_ref, tab_ref, w_ref, enc_ref, h_ref, out_ref):
    """Single forward() step."""
    idx = jnp.clip(idx_ref[0], 0, V - 1)        # VMEM loads are not bounds-checked
    tab = tab_ref[pl.ds(idx, 1), :]             # (1,128) precomputed token row
    h = h_ref[...]                              # (1,H)
    wh, wx, wo, b_h, b_x, b_o = _load_weights(tab_ref, w_ref)
    logp, h_new, attn_w = _gru_attn_step(tab, h, wh, wx, wo, b_h, b_x, b_o, enc_ref[...])
    pad = jnp.zeros((1, LANES - V - H - L), jnp.float32)
    out_ref[...] = jnp.concatenate([logp, h_new, attn_w, pad], axis=1)


def decoder_decode_kernel(idx_ref, tab_ref, w_ref, enc_ref, h_ref, out_ref, *, n_steps):
    """Greedy decode() loop: n_steps steps, weights resident, argmax feedback in-kernel."""
    idx0 = jnp.clip(idx_ref[0], 0, V - 1)
    wh, wx, wo, b_h, b_x, b_o = _load_weights(tab_ref, w_ref)
    enc = enc_ref[...]
    tok_tab = tab_ref[0:V, :]                                    # (V,128) token table
    lane_iota = jax.lax.broadcasted_iota(jnp.float32, (1, V), 1)

    out_ref[...] = jnp.zeros(out_ref.shape, jnp.float32)
    tab0 = tab_ref[pl.ds(idx0, 1), :]
    h0 = h_ref[...]

    def body(t, carry):
        h, tab = carry
        logp, h_new, attn_w = _gru_attn_step(tab, h, wh, wx, wo, b_h, b_x, b_o, enc)
        # Greedy argmax (first max wins), kept fully vectorized: no scalar extract.
        mval = jnp.max(logp, axis=1, keepdims=True)
        cand = jnp.where(logp >= mval, lane_iota, jnp.float32(V))
        sel = jnp.min(cand, axis=1, keepdims=True)               # (1,1) chosen id
        onehot = (lane_iota == sel).astype(jnp.float32)          # (1,V)
        nxt_tab = jnp.dot(onehot, tok_tab, preferred_element_type=jnp.float32)
        pad = jnp.zeros((1, LANES - V - H - L - 1), jnp.float32)
        out_ref[pl.ds(t, 1), :] = jnp.concatenate([logp, h_new, attn_w, sel, pad], axis=1)
        return (h_new, nxt_tab)

    jax.lax.fori_loop(0, n_steps, body, (h0, tab0), unroll=True)


# ---- packing (one-time, off the step path) --------------------------------
def pack_params(params):
    f32 = jnp.float32
    emb = params["embedding"].astype(f32)        # (V,H)
    attn_w = params["attn_w"].astype(f32)        # (L,2H)
    comb_w = params["comb_w"].astype(f32)        # (H,2H)
    wih = params["gru_w_ih"].astype(f32)         # (3H,H) gate order r|z|n
    whh = params["gru_w_hh"].astype(f32)         # (3H,H)

    # f32 slab: per-token precomputed tables + biases.
    tab = jnp.zeros((TAB_ROWS, LANES), f32)
    tab = tab.at[0:V, 0:H].set(emb @ comb_w[:, 0:H].T + params["comb_b"])      # combine part
    tab = tab.at[0:V, A0:A0 + L].set(emb @ attn_w[:, 0:H].T + params["attn_b"])  # attn part
    tab = tab.at[RB_H, 2 * H:3 * H].set(params["gru_b_hh"][2 * H:3 * H])       # b_hn
    bx = jnp.zeros((LANES,), f32)
    bx = bx.at[0:H].set(params["gru_b_ih"][0:H] + params["gru_b_hh"][0:H])
    bx = bx.at[H:2 * H].set(params["gru_b_ih"][H:2 * H] + params["gru_b_hh"][H:2 * H])
    bx = bx.at[2 * H:3 * H].set(params["gru_b_ih"][2 * H:3 * H])
    tab = tab.at[RB_X].set(bx)
    tab = tab.at[RB_O, 0:V].set(params["out_b"])

    # bf16 slab: static weight blocks (all transposes hoisted here).
    w = jnp.zeros((W_ROWS, LANES), f32)
    w = w.at[R_WH:R_WH + H, 0:H].set(whh[0:H].T)                  # h -> r
    w = w.at[R_WH:R_WH + H, H:2 * H].set(whh[H:2 * H].T)          # h -> z
    w = w.at[R_WH:R_WH + H, 2 * H:3 * H].set(whh[2 * H:3 * H].T)  # h -> h_n
    w = w.at[R_WH:R_WH + H, A0:A0 + L].set(attn_w[:, H:2 * H].T)  # h -> attn logits
    w = w.at[R_WX:R_WX + H, 0:H].set(wih[0:H].T)                  # x -> r
    w = w.at[R_WX:R_WX + H, H:2 * H].set(wih[H:2 * H].T)          # x -> z
    w = w.at[R_WX:R_WX + H, 2 * H:3 * H].set(wih[2 * H:3 * H].T)  # x -> i_n
    w = w.at[R_WO:R_WO + H, 0:V].set(params["out_w"].T)
    return tab, w.astype(jnp.bfloat16)


def precompute_encoder(params, encoder_outputs):
    """Per-sequence precompute: enc @ Wcomb_bot, lane-padded to 128."""
    enc_wc = encoder_outputs.astype(jnp.float32) @ params["comb_w"][:, H:2 * H].T.astype(jnp.float32)
    return jnp.zeros((L, LANES), jnp.float32).at[:, 0:H].set(enc_wc)


# ---- wrappers --------------------------------------------------------------
_SMEM = pl.BlockSpec(memory_space=pltpu.MemorySpace.SMEM)
_VMEM = pl.BlockSpec(memory_space=pltpu.MemorySpace.VMEM)


@jax.jit
def decoder_forward(tab_slab, w_slab, enc_packed, input_idx, hidden):
    """Single step (matches Decoder.forward). hidden: (1,1,H)."""
    idx = jnp.asarray(input_idx, jnp.int32).reshape((1,))
    h0 = hidden.reshape(1, H).astype(jnp.float32)
    out = pl.pallas_call(
        decoder_step_kernel,
        out_shape=jax.ShapeDtypeStruct((1, LANES), jnp.float32),
        in_specs=[_SMEM, _VMEM, _VMEM, _VMEM, _VMEM],
        out_specs=_VMEM,
    )(idx, tab_slab, w_slab, enc_packed, h0)
    logp = out[:, 0:V]
    h_new = out[:, V:V + H].reshape(1, 1, H)
    attn_w = out[:, V + H:V + H + L]
    return logp, h_new, attn_w


@partial(jax.jit, static_argnames=("length",))
def decoder_decode(tab_slab, w_slab, enc_packed, input_idx, hidden, *, length):
    """Greedy decode (matches Decoder.decode) in ONE kernel call."""
    idx = jnp.asarray(input_idx, jnp.int32).reshape((1,))
    h0 = hidden.reshape(1, H).astype(jnp.float32)
    rows = max(8, ((length + 7) // 8) * 8)
    out = pl.pallas_call(
        partial(decoder_decode_kernel, n_steps=length),
        out_shape=jax.ShapeDtypeStruct((rows, LANES), jnp.float32),
        in_specs=[_SMEM, _VMEM, _VMEM, _VMEM, _VMEM],
        out_specs=_VMEM,
    )(idx, tab_slab, w_slab, enc_packed, h0)
    ids = out[:length, O_ID].astype(jnp.int32)
    logp_seq = out[:length, 0:V]
    attn_seq = out[:length, V + H:V + H + L]
    h_fin = out[length - 1, V:V + H].reshape(1, 1, H)
    return ids, logp_seq, h_fin, attn_seq


# ---- pure-JAX reference (mirrors the PyTorch forward, eval-mode dropout) ---
def decoder_forward_ref(params, input_idx, hidden, encoder_outputs):
    emb = params["embedding"][jnp.asarray(input_idx, jnp.int32)].reshape(1, H)
    h = hidden.reshape(1, H)
    cat1 = jnp.concatenate([emb, h], axis=1)
    attn_w = jax.nn.softmax(cat1 @ params["attn_w"].T + params["attn_b"], axis=1)
    attn_applied = attn_w @ encoder_outputs
    cat2 = jnp.concatenate([emb, attn_applied], axis=1)
    x = jax.nn.relu(cat2 @ params["comb_w"].T + params["comb_b"])
    gi = x @ params["gru_w_ih"].T + params["gru_b_ih"]
    gh = h @ params["gru_w_hh"].T + params["gru_b_hh"]
    i_r, i_z, i_n = gi[:, :H], gi[:, H:2 * H], gi[:, 2 * H:]
    h_r, h_z, h_n = gh[:, :H], gh[:, H:2 * H], gh[:, 2 * H:]
    r = jax.nn.sigmoid(i_r + h_r)
    z = jax.nn.sigmoid(i_z + h_z)
    n = jnp.tanh(i_n + r * h_n)
    h_new = (1.0 - z) * n + z * h
    logp = jax.nn.log_softmax(h_new @ params["out_w"].T + params["out_b"], axis=1)
    return logp, h_new.reshape(1, 1, H), attn_w


def init_params(key):
    ks = jax.random.split(key, 11)
    s = 0.1
    f32 = jnp.float32
    return dict(
        embedding=jax.random.normal(ks[0], (V, H), f32) * s,
        attn_w=jax.random.normal(ks[1], (L, 2 * H), f32) * s,
        attn_b=jax.random.normal(ks[2], (L,), f32) * s,
        comb_w=jax.random.normal(ks[3], (H, 2 * H), f32) * s,
        comb_b=jax.random.normal(ks[4], (H,), f32) * s,
        gru_w_ih=jax.random.normal(ks[5], (3 * H, H), f32) * s,
        gru_w_hh=jax.random.normal(ks[6], (3 * H, H), f32) * s,
        gru_b_ih=jax.random.normal(ks[7], (3 * H,), f32) * s,
        gru_b_hh=jax.random.normal(ks[8], (3 * H,), f32) * s,
        out_w=jax.random.normal(ks[9], (V, H), f32) * s,
        out_b=jax.random.normal(ks[10], (V,), f32) * s,
    )


if __name__ == "__main__":
    key = jax.random.PRNGKey(0)
    pkey, ekey = jax.random.split(key)
    params = init_params(pkey)

    tab_slab, w_slab = pack_params(params)                     # one-time packing
    encoder_outputs = jax.random.normal(ekey, (L, H), jnp.float32)
    enc_packed = precompute_encoder(params, encoder_outputs)   # once per sequence
    jax.block_until_ready((tab_slab, w_slab, enc_packed))

    input_idx = 3
    hidden = jnp.zeros((1, 1, H), jnp.float32)                 # initHidden()

    # ---- single-step forward() check vs f32 reference (bf16 weight tolerance)
    logp, h_new, attn_w = decoder_forward(tab_slab, w_slab, enc_packed, input_idx, hidden)
    jax.block_until_ready((logp, h_new, attn_w))
    logp_r, h_new_r, attn_r = decoder_forward_ref(params, input_idx, hidden, encoder_outputs)
    assert logp.shape == (1, V) and h_new.shape == (1, 1, H) and attn_w.shape == (1, L)
    assert jnp.allclose(logp, logp_r, atol=5e-3, rtol=5e-3)
    assert jnp.allclose(h_new, h_new_r, atol=5e-3, rtol=5e-3)
    assert jnp.allclose(attn_w, attn_r, atol=5e-3, rtol=5e-3)

    # ---- looped greedy decode() check: reference follows the kernel's token choices
    ids, logp_seq, h_fin, attn_seq = decoder_decode(
        tab_slab, w_slab, enc_packed, input_idx, hidden, length=L)
    jax.block_until_ready((ids, logp_seq, h_fin, attn_seq))

    h_state = hidden
    inp = input_idx
    for t in range(L):
        lp_r, h_state, at_r = decoder_forward_ref(params, inp, h_state, encoder_outputs)
        assert jnp.allclose(logp_seq[t:t + 1], lp_r, atol=1e-2, rtol=1e-2)
        assert jnp.allclose(attn_seq[t:t + 1], at_r, atol=1e-2, rtol=1e-2)
        kid = int(ids[t])
        # the kernel's greedy choice must be a (numerically) valid argmax
        assert float(lp_r[0, kid]) >= float(jnp.max(lp_r)) - 1e-2
        inp = kid
    assert jnp.allclose(h_fin, h_state, atol=1e-2, rtol=1e-2)

    print("KERNEL_OK")
</pallas_src>

<mosaic_0001>
module attributes {stable_mosaic.version = 11 : i64} {
  func.func @decoder_step_kernel(%arg0: memref<1xi32, #tpu.memory_space<smem>>, %arg1: memref<24x128xf32, #tpu.memory_space<vmem>>, %arg2: memref<96x128xbf16, #tpu.memory_space<vmem>>, %arg3: memref<8x128xf32, #tpu.memory_space<vmem>>, %arg4: memref<1x32xf32, #tpu.memory_space<vmem>>, %arg5: memref<1x128xf32, #tpu.memory_space<vmem>>) attributes {dimension_semantics = [], scalar_prefetch = 0 : i64, scratch_operands = 0 : i64, tpu.core_type = #tpu.core_type<tc>} {
    %c0 = arith.constant 0 : index
    %0 = memref.load %arg0[%c0] : memref<1xi32, #tpu.memory_space<smem>>
    %c0_i32 = arith.constant 0 : i32
    %c15_i32 = arith.constant 15 : i32
    %1 = arith.maxsi %c0_i32, %0 : i32
    %2 = arith.minsi %c15_i32, %1 : i32
    %3 = arith.index_cast %2 : i32 to index
    %c0_0 = arith.constant 0 : index
    %4 = vector.load %arg1[%3, %c0_0] : memref<24x128xf32, #tpu.memory_space<vmem>>, vector<1x128xf32>
    %c0_1 = arith.constant 0 : index
    %c0_2 = arith.constant 0 : index
    %5 = vector.load %arg4[%c0_1, %c0_2] : memref<1x32xf32, #tpu.memory_space<vmem>>, vector<1x32xf32>
    %c0_3 = arith.constant 0 : index
    %c0_4 = arith.constant 0 : index
    %6 = vector.load %arg2[%c0_3, %c0_4] : memref<96x128xbf16, #tpu.memory_space<vmem>>, vector<32x128xbf16>
    %7 = arith.extf %6 : vector<32x128xbf16> to vector<32x128xf32>
    %c32 = arith.constant 32 : index
    %c0_5 = arith.constant 0 : index
    %8 = vector.load %arg2[%c32, %c0_5] : memref<96x128xbf16, #tpu.memory_space<vmem>>, vector<32x128xbf16>
    %9 = arith.extf %8 : vector<32x128xbf16> to vector<32x128xf32>
    %c64 = arith.constant 64 : index
    %c0_6 = arith.constant 0 : index
    %10 = vector.load %arg2[%c64, %c0_6] : memref<96x128xbf16, #tpu.memory_space<vmem>>, vector<32x128xbf16>
    %11 = arith.extf %10 : vector<32x128xbf16> to vector<32x128xf32>
    %c16 = arith.constant 16 : index
    %c0_7 = arith.constant 0 : index
    %12 = vector.load %arg1[%c16, %c0_7] : memref<24x128xf32, #tpu.memory_space<vmem>>, vector<1x128xf32>
    %c17 = arith.constant 17 : index
    %c0_8 = arith.constant 0 : index
    %13 = vector.load %arg1[%c17, %c0_8] : memref<24x128xf32, #tpu.memory_space<vmem>>, vector<1x128xf32>
    %c18 = arith.constant 18 : index
    %c0_9 = arith.constant 0 : index
    %14 = vector.load %arg1[%c18, %c0_9] : memref<24x128xf32, #tpu.memory_space<vmem>>, vector<1x128xf32>
    %c0_10 = arith.constant 0 : index
    %c0_11 = arith.constant 0 : index
    %15 = vector.load %arg3[%c0_10, %c0_11] : memref<8x128xf32, #tpu.memory_space<vmem>>, vector<8x128xf32>
    %cst = arith.constant dense<0.000000e+00> : vector<1x128xf32>
    %16 = tpu.matmul %5, %7, %cst {dimension_numbers = #tpu.dot_dimension_numbers<[1], [0], [0], [1], [0, 0, 1, 1], [], []>} : vector<1x32xf32>, vector<32x128xf32>, vector<1x128xf32> -> vector<1x128xf32>
    %17 = arith.addf %16, %12 : vector<1x128xf32>
    %18 = vector.extract_strided_slice %4 {offsets = [0, 96], sizes = [1, 8], strides = [1, 1]} : vector<1x128xf32> to vector<1x8xf32>
    %19 = vector.extract_strided_slice %17 {offsets = [0, 96], sizes = [1, 8], strides = [1, 1]} : vector<1x128xf32> to vector<1x8xf32>
    %20 = arith.addf %18, %19 : vector<1x8xf32>
    %cst_12 = arith.constant dense<0xFF800000> : vector<1xf32>
    %21 = vector.multi_reduction <maximumf>, %20, %cst_12 [1] : vector<1x8xf32> to vector<1xf32>
    %22 = vector.shape_cast %21 : vector<1xf32> to vector<1x1xf32>
    %23 = vector.broadcast %22 : vector<1x1xf32> to vector<1x8xf32>
    %24 = arith.subf %20, %23 : vector<1x8xf32>
    %25 = math.exp %24 : vector<1x8xf32>
    %cst_13 = arith.constant dense<0.000000e+00> : vector<1xf32>
    %26 = vector.multi_reduction <add>, %25, %cst_13 [1] : vector<1x8xf32> to vector<1xf32>
    %27 = vector.shape_cast %26 : vector<1xf32> to vector<1x1xf32>
    %28 = vector.broadcast %27 : vector<1x1xf32> to vector<1x8xf32>
    %29 = arith.divf %25, %28 : vector<1x8xf32>
    %cst_14 = arith.constant dense<0.000000e+00> : vector<1x128xf32>
    %30 = tpu.matmul %29, %15, %cst_14 {dimension_numbers = #tpu.dot_dimension_numbers<[1], [0], [0], [1], [0, 0, 1, 1], [], []>} : vector<1x8xf32>, vector<8x128xf32>, vector<1x128xf32> -> vector<1x128xf32>
    %31 = vector.extract_strided_slice %4 {offsets = [0, 0], sizes = [1, 32], strides = [1, 1]} : vector<1x128xf32> to vector<1x32xf32>
    %32 = vector.extract_strided_slice %30 {offsets = [0, 0], sizes = [1, 32], strides = [1, 1]} : vector<1x128xf32> to vector<1x32xf32>
    %33 = arith.addf %31, %32 : vector<1x32xf32>
    %cst_15 = arith.constant 0.000000e+00 : f32
    %34 = vector.broadcast %cst_15 : f32 to vector<1x32xf32>
    %35 = arith.maximumf %33, %34 : vector<1x32xf32>
    %cst_16 = arith.constant dense<0.000000e+00> : vector<1x128xf32>
    %36 = tpu.matmul %35, %9, %cst_16 {dimension_numbers = #tpu.dot_dimension_numbers<[1], [0], [0], [1], [0, 0, 1, 1], [], []>} : vector<1x32xf32>, vector<32x128xf32>, vector<1x128xf32> -> vector<1x128xf32>
    %37 = arith.addf %36, %13 : vector<1x128xf32>
    %38 = vector.extract_strided_slice %37 {offsets = [0, 0], sizes = [1, 32], strides = [1, 1]} : vector<1x128xf32> to vector<1x32xf32>
    %39 = vector.extract_strided_slice %17 {offsets = [0, 0], sizes = [1, 32], strides = [1, 1]} : vector<1x128xf32> to vector<1x32xf32>
    %40 = arith.addf %38, %39 : vector<1x32xf32>
    %41 = arith.negf %40 : vector<1x32xf32>
    %42 = math.exp %41 : vector<1x32xf32>
    %cst_17 = arith.constant 1.000000e+00 : f32
    %43 = vector.broadcast %cst_17 : f32 to vector<1x32xf32>
    %44 = arith.addf %43, %42 : vector<1x32xf32>
    %45 = arith.divf %43, %44 : vector<1x32xf32>
    %46 = vector.extract_strided_slice %37 {offsets = [0, 32], sizes = [1, 32], strides = [1, 1]} : vector<1x128xf32> to vector<1x32xf32>
    %47 = vector.extract_strided_slice %17 {offsets = [0, 32], sizes = [1, 32], strides = [1, 1]} : vector<1x128xf32> to vector<1x32xf32>
    %48 = arith.addf %46, %47 : vector<1x32xf32>
    %49 = arith.negf %48 : vector<1x32xf32>
    %50 = math.exp %49 : vector<1x32xf32>
    %cst_18 = arith.constant 1.000000e+00 : f32
    %51 = vector.broadcast %cst_18 : f32 to vector<1x32xf32>
    %52 = arith.addf %51, %50 : vector<1x32xf32>
    %53 = arith.divf %51, %52 : vector<1x32xf32>
    %54 = vector.extract_strided_slice %37 {offsets = [0, 64], sizes = [1, 32], strides = [1, 1]} : vector<1x128xf32> to vector<1x32xf32>
    %55 = vector.extract_strided_slice %17 {offsets = [0, 64], sizes = [1, 32], strides = [1, 1]} : vector<1x128xf32> to vector<1x32xf32>
    %56 = arith.mulf %45, %55 : vector<1x32xf32>
    %57 = arith.addf %54, %56 : vector<1x32xf32>
    %58 = math.tanh %57 : vector<1x32xf32>
    %cst_19 = arith.constant 1.000000e+00 : f32
    %59 = vector.broadcast %cst_19 : f32 to vector<1x32xf32>
    %60 = arith.subf %59, %53 : vector<1x32xf32>
    %61 = arith.mulf %60, %58 : vector<1x32xf32>
    %62 = arith.mulf %53, %5 : vector<1x32xf32>
    %63 = arith.addf %61, %62 : vector<1x32xf32>
    %cst_20 = arith.constant dense<0.000000e+00> : vector<1x128xf32>
    %64 = tpu.matmul %63, %11, %cst_20 {dimension_numbers = #tpu.dot_dimension_numbers<[1], [0], [0], [1], [0, 0, 1, 1], [], []>} : vector<1x32xf32>, vector<32x128xf32>, vector<1x128xf32> -> vector<1x128xf32>
    %65 = arith.addf %64, %14 : vector<1x128xf32>
    %66 = vector.extract_strided_slice %65 {offsets = [0, 0], sizes = [1, 16], strides = [1, 1]} : vector<1x128xf32> to vector<1x16xf32>
    %cst_21 = arith.constant dense<0xFF800000> : vector<1xf32>
    %67 = vector.multi_reduction <maximumf>, %66, %cst_21 [1] : vector<1x16xf32> to vector<1xf32>
    %68 = vector.shape_cast %67 : vector<1xf32> to vector<1x1xf32>
    %69 = vector.broadcast %68 : vector<1x1xf32> to vector<1x16xf32>
    %70 = arith.subf %66, %69 : vector<1x16xf32>
    %71 = math.exp %70 : vector<1x16xf32>
    %cst_22 = arith.constant dense<0.000000e+00> : vector<1xf32>
    %72 = vector.multi_reduction <add>, %71, %cst_22 [1] : vector<1x16xf32> to vector<1xf32>
    %73 = vector.shape_cast %72 : vector<1xf32> to vector<1x1xf32>
    %74 = math.log %73 : vector<1x1xf32>
    %75 = vector.broadcast %74 : vector<1x1xf32> to vector<1x16xf32>
    %76 = arith.subf %70, %75 : vector<1x16xf32>
    %cst_23 = arith.constant 0.000000e+00 : f32
    %77 = vector.broadcast %cst_23 : f32 to vector<1x72xf32>
    %78 = tpu.concatenate %76, %63, %29, %77 in 1 : vector<1x16xf32>, vector<1x32xf32>, vector<1x8xf32>, vector<1x72xf32> -> vector<1x128xf32>
    %c0_24 = arith.constant 0 : index
    %c0_25 = arith.constant 0 : index
    %79 = vector.load %arg5[%c0_24, %c0_25] : memref<1x128xf32, #tpu.memory_space<vmem>>, vector<1x128xf32>
    tpu.vector_store %arg5[%c0_24, %c0_25], %78 {strides = array<i32>} : memref<1x128xf32, #tpu.memory_space<vmem>>, vector<1x128xf32>,
    return
  }
}

</mosaic_0001>

<bundles_post_ra>
// kernel: decoder_forward.1
= control target key start
LH: loop header
LB: loop body
LE: loop exit
PB: predicated region body
PF: predicated region fallthrough
CT: control target
= control target key end

     0   :  { %11 = vsyncpa [#allocation4], 0  ;;  %s771_s0 = inlined_call_operand.<no memory space> [shape: s32[1], index: 0, kind: input, shape index: {}]   ;;  %s772_s1 = inlined_call_operand.hbm [shape: f32[24,128], index: 1, kind: input, shape index: {}]   ;;  %s773_s2 = inlined_call_operand.hbm [shape: bf16[96,128], index: 2, kind: input, shape index: {}]   ;;  %s774_s3 = inlined_call_operand.vmem [shape: f32[8,128], index: 3, kind: input, shape index: {}]   ;;  %s775_s4 = inlined_call_operand.vmem [shape: f32[1,32], index: 4, kind: input, shape index: {}]   ;;  %s776_s5 = inlined_call_operand.vmem [shape: f32[1,128], index: 5, kind: output, shape index: {}]  }
   0x1   :  { %12 = vsyncpa [#allocation6], 0  ;;  %s658_s18 = smov [#allocation3]   ;;  %s610_s22 = scalar_lea.hbm %s772_s1, 384 }
   0x2   :  { %s20_s19 = sshll.u32 %s658_s18, 4  ;;  %p611_p0 = scmp.ne.s32.totalorder %s772_s1, %s610_s22  ;;  %s21_s19 = int_to_ptr.vmem [resolvable:$true] %s20_s19 }
   0x3   :  { %p614_p1 = scmp.lt.u32.totalorder %s610_s22, %s772_s1 }
   0x5   :  { %p616_p2 = pnand %p614_p1, %p611_p0 }
   0x7   :  { %619 = shalt.err (!%p616_p2)
}
   0x8   :  { %s620_s27 = scalar_lea.vmem %s21_s19, 384  ;;  %p625_p4 = scmp.lt.s32.totalorder %s21_s19, %s21_s19 }
   0x9   :  { %p621_p3 = scmp.ne.s32.totalorder %s21_s19, %s620_s27  ;;  %p626_p5 = scmp.lt.s32.totalorder %s620_s27, %s620_s27 }
   0xb   :  { %p627_p6 = por %p626_p5, %p625_p4 }
   0xd   :  { %p628_p7 = pnand %p627_p6, %p621_p3 }
   0xf   :  { %631 = shalt.err (!%p628_p7)
}
  0x10   :  { %s659_s28 = smov 128   ;;  %s660_s29 = smov 8  }
  0x11   :  { %26 = dma.hbm_to_vmem [thread:$0]  %s772_s1, 384, %s21_s19, [#allocation4], %s659_s28, %s659_s28, %s660_s29  }
  0x12   :  { %s661_s7 = smov [#allocation5]   ;;  %s632_s11 = scalar_lea.hbm %s773_s2, 768 }
  0x13   :  { %s32_s8 = sshll.u32 %s661_s7, 4  ;;  %p633_p8 = scmp.ne.s32.totalorder %s773_s2, %s632_s11  ;;  %s33_s8 = int_to_ptr.vmem [resolvable:$true] %s32_s8 }
  0x14   :  { %p636_p9 = scmp.lt.u32.totalorder %s632_s11, %s773_s2 }
  0x16   :  { %p638_p10 = pnand %p636_p9, %p633_p8 }
  0x18   :  { %641 = shalt.err (!%p638_p10)
}
  0x19   :  { %s642_s16 = scalar_lea.vmem %s33_s8, 768  ;;  %p647_p12 = scmp.lt.s32.totalorder %s33_s8, %s33_s8 }
  0x1a   :  { %p643_p11 = scmp.ne.s32.totalorder %s33_s8, %s642_s16  ;;  %p648_p13 = scmp.lt.s32.totalorder %s642_s16, %s642_s16 }
  0x1c   :  { %p649_p0 = por %p648_p13, %p647_p12 }
  0x1e   :  { %p650_p1 = pnand %p649_p0, %p643_p11 }
  0x20   :  { %653 = shalt.err (!%p650_p1)
}
  0x21   :  { %s662_s1 = smov 64   ;;  %s663_s17 = smov 4  }
  0x22   :  { %38 = dma.hbm_to_vmem [thread:$0]  %s773_s2, 768, %s33_s8, [#allocation6], %s662_s1, %s662_s1, %s663_s17  }
  0x23   :  { %654 = dma.done.wait [#allocation4], 384  }
  0x24   :  { %655 = vsyncadd [#allocation4], 4294966912 }
  0x25   :  { %656 = dma.done.wait [#allocation6], 768  }
  0x26   :  { %657 = vsyncadd [#allocation6], 4294966528  ;;  %v664_v0 = vmov 0.0|0.0   ;;  %vm665_vm0 = vmmov 0   ;;  %v666_v1 = vmov 0.0   ;;  %v482_v2 = vld [vmem:[#allocation5] sm:$0xff]   ;;  %v352_v37 = vlaneseq }
  0x27   :  { %565 = vmatprep.subr.bf16.mxu0 %v664_v0  ;;  %535 = vmatprep.mubr.msk.f32.mxu0 %vm665_vm0, %v666_v1  ;;  %v505_v3 = vld [vmem:[#allocation5 + $0x8] sm:$0xff]   ;;  %vm85_vm1 = vcmask 261120   ;;  %p50_p2 = scmp.gt.s32.totalorder %s771_s0, 0  ;;  %p469_p3 = scmp.lt.s32.totalorder %s771_s0, 15  ;;  %v81_v5 = vld [vmem:[#allocation3 + $0x10] sm:$0x1] }
  0x28   :  { %538 = vmatprep.subr.mxu1 %v666_v1  ;;  %540 = vmatprep.mubr.msk.f32.mxu1 %vm665_vm0, %v666_v1  ;;  %v734_v4 = vld [vmem:[%s775_s4] sm:$0x1]  ;;  %vm160_vm2 = vcmask 844544   ;;  %s667_s28 = smov 32   ;;  %vm171_vm3 = vcmask 57344   ;;  %vm180_vm4 = vcmask 64512  }
  0x29   :  { %567 = vmatpush3.bf16.msra.mxu0 %v482_v2  ;;  %s51_s25 = scalar_select %p50_p2, %s771_s0, 0  ;;  %v84_v18 = vld [vmem:[%s774_s3] sm:$0xff]  ;;  %v506_v22 = vld [vmem:[#allocation5 + $0x10] sm:$0xff]   ;;  %v507_v24 = vld [vmem:[#allocation5 + $0x18] sm:$0xff]   ;;  %v353_v38 = vshrl.u32 %v352_v37, 7  ;;  %vm436_vm5 = vcmask 122880  }
  0x2a   :  { %568 = vmatprep.subr.bf16.mxu0 %v664_v0  ;;  %539 = vmatpush3.msra.mxu1 %v84_v18  ;;  %v82_v29 = vld [vmem:[#allocation3 + $0x11] sm:$0x1]  ;;  %v508_v46 = vld [vmem:[#allocation5 + $0x20] sm:$0xff]   ;;  %v509_v47 = vld [vmem:[#allocation5 + $0x28] sm:$0xff]   ;;  %s668_s3 = smov 96   ;;  %s669_s30 = smov 80  }
  0x2b   :  { %s778_s25 = smov (!%p469_p3, %s51_s25), 15  ;;  %571 = vmatprep.subr.bf16.mxu1 %v664_v0  ;;  %v354_v39 = vsub.s32 0, %v353_v38  ;;  %v83_v56 = vld [vmem:[#allocation3 + $0x12] sm:$0x1]  ;;  %s670_s6 = smov 112   ;;  %vm455_vm6 = vcmask 130048  }
  0x2c   :  { %s54_s4 = scalar_lea.vmem [#allocation3], %s778_s25  ;;  %vm457_vm7 = vcmask 392192   ;;  %vm459_vm8 = vcmask 457728  }
  0x2d   :  { %570 = vmatpush3.bf16.msra.mxu0 %v505_v3  ;;  %v55_v7 = vld [vmem:[%s54_s4] sm:$0x1]  ;;  %v355_v43 = vrot.slane %v734_v4, %v354_v39 }
  0x2e   :  { %577 = vmatprep.subr.bf16.mxu0 %v664_v0 }
  0x30   :  { %536 = vmatmul.mubr.msk.f32.vlgmr.msra.gmra.mrb[0].mxu0 %vm85_vm1, %v734_v4 }
  0x31   :  { %562 = vmatprep.mubr.msk.f32.mxu0 %vm665_vm0, %v666_v1  ;;  %579 = vmatpush3.bf16.msra.mxu0 %v508_v46 }
  0x32   :  { %580 = vmatprep.subr.bf16.mxu0 %v664_v0 }
  0x35   :  { %582 = vmatpush3.bf16.msra.mxu0 %v509_v47 }
 0x103   :  { %v155_v6 = vpop.f32.mrb[0].mxu0 }
 0x104   :  { %v156_v8 = vadd.f32 %v155_v6, %v81_v5  ;;  %v537_v9 = vpop.f32.mrb[1].mxu0 }
 0x106   :  { %v159_v10 = vadd.f32 %v156_v8, %v55_v7 }
 0x108   :  { %v161_v11 = vsel %vm160_vm2, %v159_v10, -inf }
 0x109   :  { %162 = vmax.xlane.f32.xlu0 %v161_v11 }
 0x196   :  { %v163_v12 = vpop.xlane.xlu0 %162 }
 0x197   :  { %v164_v13 = vsub.f32 %v159_v10, %v163_v12 }
 0x199   :  { %v165_v14 = vmul.f32 1.442695, %v164_v13 }
 0x19b   :  { %596 = vpow2.f32 %v165_v14 }
 0x1a5   :  { %v597_v15 = vpop.eup %596 }
 0x1a6   :  { %168 = vrot.lane.b32.xlu0 %v597_v15, %s667_s28 }
 0x218   :  { %v169_v16 = vpop.permute.xlu0 %168 }
 0x219   :  { %v172_v17 = vsel %vm171_vm3, %v169_v16, 0.0 }
 0x21a   :  { %173 = vadd.xlane.f32.xlu1 %v172_v17 }
 0x2a7   :  { %v174_v19 = vpop.xlane.xlu1 %173 }
 0x2a8   :  { %598 = vrcp.f32 %v174_v19 }
 0x2b2   :  { %v599_v20 = vpop.eup %598 }
 0x2b3   :  { %v754_v21 = vmul.f32 %v599_v20, %v597_v15 }
 0x2b5   :  { %178 = vrot.lane.b32.xlu1 %v754_v21, %s667_s28 }
 0x2b9   :  { %336 = vrot.lane.b32.xlu1 %v156_v8, %s662_s1 }
 0x327   :  { %v179_v23 = vpop.permute.xlu1 %178 }
 0x328   :  { %541 = vmatmul.mubr.msk.f32.vlgmr.msra.gmra.mrb[0].mxu1 %vm180_vm4, %v179_v23 }
 0x329   :  { %573 = vmatpush3.bf16.msra.mxu1 %v506_v22  ;;  %551 = vmatprep.mubr.msk.f32.mxu1 %vm665_vm0, %v666_v1 }
 0x32a   :  { %574 = vmatprep.subr.bf16.mxu1 %v664_v0 }
 0x32b   :  { %v337_v41 = vpop.permute.xlu1 %336 }
 0x32d   :  { %576 = vmatpush3.bf16.msra.mxu1 %v507_v24 }
 0x3fb   :  { %v249_v25 = vpop.f32.mrb[0].mxu1 }
 0x3fc   :  { %v253_v26 = vadd.f32 %v249_v25, %v55_v7  ;;  %v542_v27 = vpop.f32.mrb[1].mxu1 }
 0x3fe   :  { %v254_v28 = vmax.f32 %v253_v26, 0.0 }
 0x400   :  { %552 = vmatmul.mubr.msk.f32.vlgmr.msra.gmra.mrb[2].mxu1 %vm85_vm1, %v254_v28 }
 0x4d3   :  { %v324_v30 = vpop.f32.mrb[2].mxu1 }
 0x4d4   :  { %v325_v31 = vadd.f32 %v324_v30, %v82_v29  ;;  %v553_v32 = vpop.f32.mrb[3].mxu1 }
 0x4d6   :  { %v328_v33 = vadd.f32 %v325_v31, %v156_v8 }
 0x4d8   :  { %v477_v34 = vmul.f32 -1.442695, %v328_v33 }
 0x4da   :  { %600 = vpow2.f32 %v477_v34 }
 0x4e4   :  { %v601_v35 = vpop.eup %600 }
 0x4e5   :  { %v332_v36 = vadd.f32 1.0, %v601_v35 }
 0x4e7   :  { %602 = vrcp.f32 %v332_v36 }
 0x4f1   :  { %v603_v40 = vpop.eup %602 }
 0x4f2   :  { %v339_v42 = vmul.f32 %v603_v40, %v337_v41  ;;  %v346_v50 = vsub.f32 1.0, %v603_v40 }
 0x4f4   :  { %341 = vrot.lane.b32.xlu1 %v339_v42, %s662_s1 }
 0x4f8   :  { %356 = vrot.lane.b32.xlu1 %v355_v43, %s667_s28 }
 0x566   :  { %v342_v44 = vpop.permute.xlu1 %341 }
 0x567   :  { %v344_v45 = vadd.f32 %v342_v44, %v325_v31 }
 0x569   :  { %604 = vtanh.f32 %v344_v45 }
 0x56a   :  { %v357_v49 = vpop.permute.xlu1 %356 }
 0x56b   :  { %v359_v52 = vmul.f32 %v603_v40, %v357_v49 }
 0x573   :  { %v605_v48 = vpop.eup %604 }
 0x574   :  { %348 = vrot.lane.b32.xlu0 %v605_v48, %s668_s3 }
 0x5e6   :  { %v349_v51 = vpop.permute.xlu0 %348 }
 0x5e7   :  { %v351_v53 = vmul.f32 %v349_v51, %v346_v50 }
 0x5e9   :  { %v360_v54 = vadd.f32 %v359_v52, %v351_v53 }
 0x5eb   :  { %362 = vrot.lane.b32.xlu0 %v360_v54, %s668_s3 }
 0x65d   :  { %v363_v55 = vpop.permute.xlu0 %362 }
 0x65e   :  { %563 = vmatmul.mubr.msk.f32.vlgmr.msra.gmra.mrb[2].mxu0 %vm85_vm1, %v363_v55 }
 0x731   :  { %v432_v57 = vpop.f32.mrb[2].mxu0 }
 0x732   :  { %v433_v58 = vadd.f32 %v432_v57, %v83_v56  ;;  %v564_v59 = vpop.f32.mrb[3].mxu0 }
 0x734   :  { %v437_v60 = vsel %vm436_vm5, %v433_v58, -inf }
 0x735   :  { %438 = vmax.xlane.f32.xlu1 %v437_v60 }
 0x746   :  { %452 = vrot.lane.b32.xlu1 %v754_v21, %s669_s30 }
 0x7c2   :  { %v439_v61 = vpop.xlane.xlu1 %438 }
 0x7c3   :  { %v440_v62 = vsub.f32 %v433_v58, %v439_v61 }
 0x7c5   :  { %v441_v63 = vmul.f32 1.442695, %v440_v62 }
 0x7c6   :  { %v453_v7 = vpop.permute.xlu1 %452 }
 0x7c7   :  { %606 = vpow2.f32 %v441_v63 }
 0x7d1   :  { %v607_v0 = vpop.eup %606 }
 0x7d2   :  { %v443_v1 = vsel %vm436_vm5, %v607_v0, 0.0 }
 0x7d3   :  { %444 = vadd.xlane.f32.xlu0 %v443_v1 }
 0x7e9   :  { %449 = vrot.lane.b32.xlu0 %v360_v54, %s670_s6 }
 0x860   :  { %v445_v2 = vpop.xlane.xlu0 %444 }
 0x861   :  { %608 = vlog2.f32 %v445_v2 }
 0x864   :  { %v450_v6 = vpop.permute.xlu0 %449 }
 0x86b   :  { %v609_v3 = vpop.eup %608 }
 0x86c   :  { %v447_v4 = vmul.f32 0.6931472, %v609_v3 }
 0x86e   :  { %v448_v5 = vsub.f32 %v440_v62, %v447_v4 }
 0x870   :  { %v456_v8 = vsel %vm455_vm6, %v448_v5, %v450_v6 }
 0x871   :  { %v458_v9 = vsel %vm457_vm7, %v456_v8, %v453_v7 }
 0x872   :  { %v460_v10 = vsel %vm459_vm8, %v458_v9, 0.0 }
 0x873   :  { %461 = vst [vmem:[%s776_s5] sm:$0x1] %v460_v10 }
 0x874   :  { %466 = vsyncpa [#allocation4], 1 }
 0x875   :  { %467 = vsyncpa [#allocation6], 1 }

</bundles_post_ra>
